<compile_context>
chip_gen: v7x
topology: tpu7x:2x2x1
jax: 0.10.0
libtpu: 0.0.40
codegen_flags: <defaults>
</compile_context>

<pallas_src>
import jax
import jax.numpy as jnp
from jax.experimental import pallas as pl
from jax.experimental.pallas import tpu as pltpu


_LANE = 128
_TARGET_BLOCK_BYTES = 4 * 1024 * 1024    # ~4 MiB blocks (good on v5e/v6e/v7x)
_MIN_BLOCK_BYTES = 512 * 1024            # never shrink blocks below this when splitting
_MIN_GRID_STEPS = 4                      # give v7x's two TCs several steps each
_SMALL_FAST_PATH_BYTES = 64 * 1024       # tiny inputs: plain XLA beats a kernel launch
_VMEM_LIMIT_BYTES = 48 * 1024 * 1024     # < v7x's 64 MiB/TC physical; ample on v5e/v6e


def _norm_kernel(stats_ref, x_ref, o_ref):
    # stats_ref (SMEM, scalar-prefetched): [mean, inv_std] in f32.
    mean = stats_ref[0]
    inv_std = stats_ref[1]
    xf = x_ref[...].astype(jnp.float32)
    o_ref[...] = ((xf - mean) * inv_std).astype(o_ref.dtype)


def _norm_2d(x2d: jax.Array, stats: jax.Array, block_rows: int) -> jax.Array:
    rows, width = x2d.shape
    grid = (pl.cdiv(rows, block_rows),)
    return pl.pallas_call(
        _norm_kernel,
        out_shape=jax.ShapeDtypeStruct((rows, width), x2d.dtype),
        grid_spec=pltpu.PrefetchScalarGridSpec(
            num_scalar_prefetch=1,
            grid=grid,
            in_specs=[pl.BlockSpec((block_rows, width), lambda i, stats_ref: (i, 0))],
            out_specs=pl.BlockSpec((block_rows, width), lambda i, stats_ref: (i, 0)),
        ),
        compiler_params=pltpu.CompilerParams(
            dimension_semantics=("parallel",),
            vmem_limit_bytes=_VMEM_LIMIT_BYTES,
        ),
    )(stats, x2d)


def precomputed_norm(x: jax.Array, mean, std) -> jax.Array:
    """(x - mean) / std, elementwise, on TPU via Pallas. mean/std are scalars."""
    orig_shape = x.shape
    dtype = x.dtype
    total = x.size
    itemsize = jnp.dtype(dtype).itemsize

    mean_f = jnp.asarray(mean, jnp.float32)
    std_f = jnp.asarray(std, jnp.float32)
    if mean_f.ndim != 0 or std_f.ndim != 0:
        raise ValueError(
            "PrecomputedNorm kernel expects scalar mean/std "
            "(per-channel stats are not supported)."
        )
    inv_std_f = jnp.float32(1.0) / std_f
    stats = jnp.stack([mean_f, inv_std_f])

    def jnp_norm(arr):
        return ((arr.astype(jnp.float32) - mean_f) * inv_std_f).astype(dtype)

    # Fast path: tiny tensors — launch/pipeline overhead dominates any kernel.
    if total * itemsize < _SMALL_FAST_PATH_BYTES:
        return jnp_norm(x)

    flat = x.reshape(-1)

    # Ragged sizes: Pallas handles the 128-aligned prefix; the <128-element
    # tail is computed with plain jnp (no full pad/slice round trip).
    tail_out = None
    aligned = total - (total % _LANE)
    if aligned == 0:
        return jnp_norm(x)
    if aligned != total:
        tail_out = jnp_norm(flat[aligned:])
        flat = flat[:aligned]

    # Lane-dense width: largest multiple of 128 (capped at 2048) dividing the
    # aligned element count.
    q = aligned // _LANE
    width = _LANE
    for w in (16, 8, 4, 2, 1):
        if q % w == 0:
            width = w * _LANE
            break

    rows = aligned // width
    x2d = flat.reshape(rows, width)

    # Sublane packing for the dtype: 8 rows (f32), 16 (bf16/f16), 32 (int8/fp8).
    sublane = max(8, 32 // itemsize)

    # Block rows: ~4 MiB per block, aligned to the sublane packing.
    target_rows = max(sublane, _TARGET_BLOCK_BYTES // (width * itemsize))
    block_rows = min(rows, target_rows)
    if block_rows >= sublane:
        block_rows = (block_rows // sublane) * sublane
    else:
        block_rows = rows  # full extent (legal even if < sublane)

    # Ensure several grid steps (dual-TC sharding on v7x) as long as each
    # block stays >= ~512 KiB.
    if pl.cdiv(rows, block_rows) < _MIN_GRID_STEPS:
        min_block_rows = max(
            sublane, ((_MIN_BLOCK_BYTES // (width * itemsize)) // sublane) * sublane
        )
        candidate = ((rows // _MIN_GRID_STEPS) // sublane) * sublane
        if candidate >= min_block_rows:
            block_rows = candidate

    out2d = _norm_2d(x2d, stats, block_rows)

    out = out2d.reshape(-1)
    if tail_out is not None:
        out = jnp.concatenate([out, tail_out])
    return out.reshape(orig_shape)


if __name__ == "__main__":
    key = jax.random.PRNGKey(0)
    k1, k2, k3, k4 = jax.random.split(key, 4)

    # 1) Typical small NCHW input (module's usual scale) -> XLA fast path.
    x_small = jax.random.normal(k1, (2, 4, 16, 16), dtype=jnp.float32)
    y_small = jax.block_until_ready(precomputed_norm(x_small, 0.5, 2.0))
    ref_small = (x_small - 0.5) / 2.0
    assert y_small.shape == x_small.shape and y_small.dtype == x_small.dtype
    assert jnp.allclose(y_small, ref_small, atol=1e-6, rtol=1e-6)

    # 2) 128-aligned input big enough to take the Pallas path.
    x_al = jax.random.normal(k2, (2, 8, 64, 32), dtype=jnp.float32)
    y_al = jax.block_until_ready(precomputed_norm(x_al, 0.5, 2.0))
    ref_al = (x_al - 0.5) / 2.0
    assert y_al.shape == x_al.shape and y_al.dtype == x_al.dtype
    assert jnp.allclose(y_al, ref_al, atol=1e-6, rtol=1e-6)

    # 3) Ragged element count (Pallas prefix + jnp tail, partial last block).
    x_rg = jax.random.normal(k3, (3, 5, 37, 31), dtype=jnp.float32)
    y_rg = jax.block_until_ready(precomputed_norm(x_rg, 1.25, 0.75))
    ref_rg = (x_rg - 1.25) / 0.75
    assert y_rg.shape == x_rg.shape and y_rg.dtype == x_rg.dtype
    assert jnp.allclose(y_rg, ref_rg, atol=1e-5, rtol=1e-5)

    # 4) bf16 input (exercises 16-row sublane alignment and cast-on-store).
    x_bf = jax.random.normal(k4, (2, 8, 64, 64), dtype=jnp.bfloat16)
    y_bf = jax.block_until_ready(precomputed_norm(x_bf, 0.25, 1.5))
    ref_bf = ((x_bf.astype(jnp.float32) - 0.25) / 1.5).astype(jnp.bfloat16)
    assert y_bf.shape == x_bf.shape and y_bf.dtype == jnp.bfloat16
    assert jnp.allclose(
        y_bf.astype(jnp.float32), ref_bf.astype(jnp.float32), atol=2e-2, rtol=2e-2
    )

    print("KERNEL_OK")
</pallas_src>

<mosaic_0001>
module attributes {stable_mosaic.version = 11 : i64} {
  func.func @_norm_kernel(%arg0: i32, %arg1: memref<2xf32, #tpu.memory_space<smem>>, %arg2: memref<16x2048xf32, #tpu.memory_space<vmem>>, %arg3: memref<16x2048xf32, #tpu.memory_space<vmem>>) attributes {dimension_semantics = [#tpu.dimension_semantics<parallel>], iteration_bounds = array<i64: 1>, scalar_prefetch = 1 : i64, scratch_operands = 0 : i64, tpu.core_type = #tpu.core_type<tc>, window_params = [{transform_indices = @transform_0, window_bounds = array<i64: 16, 2048>}, {transform_indices = @transform_1, window_bounds = array<i64: 16, 2048>}]} {
    %c0 = arith.constant 0 : index
    %0 = memref.load %arg1[%c0] : memref<2xf32, #tpu.memory_space<smem>>
    %c1 = arith.constant 1 : index
    %1 = memref.load %arg1[%c1] : memref<2xf32, #tpu.memory_space<smem>>
    %c0_0 = arith.constant 0 : index
    %c0_1 = arith.constant 0 : index
    %2 = vector.load %arg2[%c0_0, %c0_1] : memref<16x2048xf32, #tpu.memory_space<vmem>>, vector<16x2048xf32>
    %3 = vector.broadcast %0 : f32 to vector<16x2048xf32>
    %4 = arith.subf %2, %3 : vector<16x2048xf32>
    %5 = vector.broadcast %1 : f32 to vector<16x2048xf32>
    %6 = arith.mulf %4, %5 : vector<16x2048xf32>
    %c0_2 = arith.constant 0 : index
    %c0_3 = arith.constant 0 : index
    %7 = vector.load %arg3[%c0_2, %c0_3] : memref<16x2048xf32, #tpu.memory_space<vmem>>, vector<16x2048xf32>
    tpu.vector_store %arg3[%c0_2, %c0_3], %6 {strides = array<i32>} : memref<16x2048xf32, #tpu.memory_space<vmem>>, vector<16x2048xf32>,
    return
  }
  func.func @transform_0(%arg0: i32, %arg1: memref<2xf32, #tpu.memory_space<smem>>) -> (i32, i32) {
    %c0_i32 = arith.constant 0 : i32
    %c0_i32_0 = arith.constant 0 : i32
    return %arg0, %c0_i32 : i32, i32
  }
  func.func @transform_1(%arg0: i32, %arg1: memref<2xf32, #tpu.memory_space<smem>>) -> (i32, i32) {
    %c0_i32 = arith.constant 0 : i32
    %c0_i32_0 = arith.constant 0 : i32
    return %arg0, %c0_i32 : i32, i32
  }
}

</mosaic_0001>

<bundles_post_ra>
// kernel: tpu_custom_call.1
= control target key start
LH: loop header
LB: loop body
LE: loop exit
PB: predicated region body
PF: predicated region fallthrough
CT: control target
= control target key end

     0   :  { %s373_s0 = inlined_call_operand.hbm [shape: f32[2], index: 0, kind: input, shape index: {}]   ;;  %s374_s1 = inlined_call_operand.hbm [shape: f32[16,2048], index: 1, kind: input, shape index: {}]   ;;  %s375_s2 = inlined_call_operand.hbm [shape: f32[16,2048], index: 2, kind: output, shape index: {}]  }
   0x1   :  { %s183_s11 = scalar_lea.hbm %s373_s0, 16 }
   0x2   :  { %p184_p0 = scmp.ne.s32.totalorder %s373_s0, %s183_s11  ;;  %p187_p1 = scmp.lt.u32.totalorder %s183_s11, %s373_s0 }
   0x4   :  { %p189_p2 = pnand %p187_p1, %p184_p0 }
   0x6   :  { %192 = shalt.err (!%p189_p2)  }
   0x7   :  { %s243_s16 = smov [#allocation3]  }
   0x8   :  { %8 = dma.hbm_to_smem %s373_s0, 16, %s243_s16, [#allocation2] }
   0x9   :  { %237 = dma.done.wait [#allocation2], 16 }
   0xa   :  { %238 = vsyncadd [#allocation2], 4294967280 }
   0xb   :  { %10 = sfence }
   0xc   :  { %11 = vsyncpa [#allocation5], 0 }
   0xd   :  { %12 = vsyncpa [#allocation6], 0  ;;  %s244_s19 = smov [#allocation4]   ;;  %s193_s23 = scalar_lea.hbm %s374_s1, 4096 }
   0xe   :  { %s18_s20 = sshll.u32 %s244_s19, 4  ;;  %p194_p3 = scmp.ne.s32.totalorder %s374_s1, %s193_s23  ;;  %s19_s20 = int_to_ptr.vmem [resolvable:$true] %s18_s20 }
   0xf   :  { %p197_p4 = scmp.lt.u32.totalorder %s193_s23, %s374_s1 }
  0x11   :  { %p199_p5 = pnand %p197_p4, %p194_p3 }
  0x13   :  { %202 = shalt.err (!%p199_p5)
}
  0x14   :  { %s203_s0 = scalar_lea.vmem %s19_s20, 4096  ;;  %p208_p7 = scmp.lt.s32.totalorder %s19_s20, %s19_s20 }
  0x15   :  { %p204_p6 = scmp.ne.s32.totalorder %s19_s20, %s203_s0  ;;  %p209_p8 = scmp.lt.s32.totalorder %s203_s0, %s203_s0 }
  0x17   :  { %p210_p9 = por %p209_p8, %p208_p7 }
  0x19   :  { %p211_p10 = pnand %p210_p9, %p204_p6 }
  0x1b   :  { %214 = shalt.err (!%p211_p10)
}
  0x1c   :  { %s245_s28 = smov 2048   ;;  %s246_s29 = smov 128  }
  0x1d   :  { %24 = dma.hbm_to_vmem [thread:$0]  %s374_s1, 4096, %s19_s20, [#allocation5], %s245_s28, %s245_s28, %s246_s29  }
  0x1e   :  { %239 = dma.done.wait [#allocation5], 4096  }
  0x1f   :  { %240 = vsyncadd [#allocation5], 4294963200  ;;  %s28_s4 = sld [smem:[#allocation3]]  ;;  %s177_s5 = sld [smem:[#allocation3 + $0x1]]  ;;  %v30_v0 = vld [vmem:[#allocation4] sm:$0xff]  ;;  %v31_v3 = vld [vmem:[#allocation4 + $0x8] sm:$0xff] }
  0x20   :  { %v32_v4 = vld [vmem:[#allocation4 + $0x10] sm:$0xff]  ;;  %v33_v8 = vld [vmem:[#allocation4 + $0x18] sm:$0xff]  ;;  %v34_v9 = vld [vmem:[#allocation4 + $0x20] sm:$0xff]  ;;  %s247_s1 = smov [#allocation7]  }
  0x21   :  { %v35_v10 = vld [vmem:[#allocation4 + $0x28] sm:$0xff]  ;;  %v36_v14 = vld [vmem:[#allocation4 + $0x30] sm:$0xff]  ;;  %v37_v15 = vld [vmem:[#allocation4 + $0x38] sm:$0xff]  ;;  %s165_s6 = sshll.u32 %s247_s1, 4  ;;  %s166_s6 = int_to_ptr.vmem [resolvable:$true] %s165_s6 }
  0x22   :  { %v38_v16 = vld [vmem:[#allocation4 + $0x40] sm:$0xff]  ;;  %v39_v21 = vld [vmem:[#allocation4 + $0x48] sm:$0xff]  ;;  %v40_v22 = vld [vmem:[#allocation4 + $0x50] sm:$0xff]  ;;  %s215_s7 = scalar_lea.vmem %s166_s6, 4096  ;;  %p220_p12 = scmp.lt.s32.totalorder %s166_s6, %s166_s6 }
  0x23   :  { %v41_v23 = vld [vmem:[#allocation4 + $0x58] sm:$0xff]  ;;  %v42_v28 = vld [vmem:[#allocation4 + $0x60] sm:$0xff]  ;;  %v43_v29 = vld [vmem:[#allocation4 + $0x68] sm:$0xff]  ;;  %p216_p11 = scmp.ne.s32.totalorder %s166_s6, %s215_s7  ;;  %p221_p13 = scmp.lt.s32.totalorder %s215_s7, %s215_s7 }
  0x24   :  { %v44_v30 = vld [vmem:[#allocation4 + $0x70] sm:$0xff]  ;;  %v45_v35 = vld [vmem:[#allocation4 + $0x78] sm:$0xff]  ;;  %v46_v40 = vld [vmem:[#allocation4 + $0x80] sm:$0xff] }
  0x25   :  { %v290_v1 = vstv %s28_s4  ;;  %v292_v2 = vstv %s177_s5  ;;  %v47_v41 = vld [vmem:[#allocation4 + $0x88] sm:$0xff]  ;;  %v48_v42 = vld [vmem:[#allocation4 + $0x90] sm:$0xff]  ;;  %v49_v47 = vld [vmem:[#allocation4 + $0x98] sm:$0xff]  ;;  %p222_p0 = por %p221_p13, %p220_p12 }
  0x26   :  { %v63_v5 = vsub.f32 %v30_v0, %v290_v1  ;;  %v64_v6 = vsub.f32 %v31_v3, %v290_v1  ;;  %v65_v7 = vsub.f32 %v32_v4, %v290_v1  ;;  %v66_v11 = vsub.f32 %v33_v8, %v290_v1  ;;  %v50_v48 = vld [vmem:[#allocation4 + $0xa0] sm:$0xff]  ;;  %v51_v49 = vld [vmem:[#allocation4 + $0xa8] sm:$0xff]  ;;  %v52_v54 = vld [vmem:[#allocation4 + $0xb0] sm:$0xff] }
  0x27   :  { %v67_v12 = vsub.f32 %v34_v9, %v290_v1  ;;  %v68_v13 = vsub.f32 %v35_v10, %v290_v1  ;;  %v69_v20 = vsub.f32 %v36_v14, %v290_v1  ;;  %v70_v27 = vsub.f32 %v37_v15, %v290_v1  ;;  %v53_v59 = vld [vmem:[#allocation4 + $0xb8] sm:$0xff]  ;;  %v54_v0 = vld [vmem:[#allocation4 + $0xc0] sm:$0xff]  ;;  %v55_v3 = vld [vmem:[#allocation4 + $0xc8] sm:$0xff]  ;;  %p223_p1 = pnand %p222_p0, %p216_p11 }
  0x28   :  { %v96_v17 = vmul.f32 %v292_v2, %v63_v5  ;;  %v97_v18 = vmul.f32 %v292_v2, %v64_v6  ;;  %v98_v19 = vmul.f32 %v292_v2, %v65_v7  ;;  %v99_v24 = vmul.f32 %v292_v2, %v66_v11  ;;  %v56_v4 = vld [vmem:[#allocation4 + $0xd0] sm:$0xff]  ;;  %v57_v9 = vld [vmem:[#allocation4 + $0xd8] sm:$0xff]  ;;  %v58_v10 = vld [vmem:[#allocation4 + $0xe0] sm:$0xff] }
  0x29   :  { %v100_v25 = vmul.f32 %v292_v2, %v67_v12  ;;  %v101_v26 = vmul.f32 %v292_v2, %v68_v13  ;;  %v102_v31 = vmul.f32 %v292_v2, %v69_v20  ;;  %v71_v32 = vsub.f32 %v38_v16, %v290_v1  ;;  %v59_v11 = vld [vmem:[#allocation4 + $0xe8] sm:$0xff]  ;;  %v60_v16 = vld [vmem:[#allocation4 + $0xf0] sm:$0xff] }
  0x2a   :  { %128 = vst [vmem:[#allocation7] sm:$0xff] %v96_v17  ;;  %129 = vst [vmem:[#allocation7 + $0x8] sm:$0xff] %v97_v18  ;;  %v72_v33 = vsub.f32 %v39_v21, %v290_v1  ;;  %v73_v34 = vsub.f32 %v40_v22, %v290_v1  ;;  %v103_v36 = vmul.f32 %v292_v2, %v70_v27  ;;  %v61_v21 = vld [vmem:[#allocation4 + $0xf8] sm:$0xff] }
  0x2b   :  { %130 = vst [vmem:[#allocation7 + $0x10] sm:$0xff] %v98_v19  ;;  %131 = vst [vmem:[#allocation7 + $0x18] sm:$0xff] %v99_v24  ;;  %v74_v37 = vsub.f32 %v41_v23, %v290_v1  ;;  %v75_v38 = vsub.f32 %v42_v28, %v290_v1  ;;  %v76_v39 = vsub.f32 %v43_v29, %v290_v1 }
  0x2c   :  { %132 = vst [vmem:[#allocation7 + $0x20] sm:$0xff] %v100_v25  ;;  %133 = vst [vmem:[#allocation7 + $0x28] sm:$0xff] %v101_v26  ;;  %v104_v43 = vmul.f32 %v292_v2, %v71_v32  ;;  %v105_v44 = vmul.f32 %v292_v2, %v72_v33  ;;  %v106_v45 = vmul.f32 %v292_v2, %v73_v34 }
  0x2d   :  { %134 = vst [vmem:[#allocation7 + $0x30] sm:$0xff] %v102_v31  ;;  %v77_v46 = vsub.f32 %v44_v30, %v290_v1  ;;  %135 = vst [vmem:[#allocation7 + $0x38] sm:$0xff] %v103_v36  ;;  %v107_v50 = vmul.f32 %v292_v2, %v74_v37  ;;  %v108_v51 = vmul.f32 %v292_v2, %v75_v38 }
  0x2e   :  { %v109_v52 = vmul.f32 %v292_v2, %v76_v39  ;;  %v78_v53 = vsub.f32 %v45_v35, %v290_v1  ;;  %136 = vst [vmem:[#allocation7 + $0x40] sm:$0xff] %v104_v43  ;;  %137 = vst [vmem:[#allocation7 + $0x48] sm:$0xff] %v105_v44  ;;  %v79_v56 = vsub.f32 %v46_v40, %v290_v1 }
  0x2f   :  { %138 = vst [vmem:[#allocation7 + $0x50] sm:$0xff] %v106_v45  ;;  %v110_v55 = vmul.f32 %v292_v2, %v77_v46  ;;  %v80_v57 = vsub.f32 %v47_v41, %v290_v1  ;;  %v81_v58 = vsub.f32 %v48_v42, %v290_v1  ;;  %139 = vst [vmem:[#allocation7 + $0x58] sm:$0xff] %v107_v50 }
  0x30   :  { %140 = vst [vmem:[#allocation7 + $0x60] sm:$0xff] %v108_v51  ;;  %141 = vst [vmem:[#allocation7 + $0x68] sm:$0xff] %v109_v52  ;;  %v111_v60 = vmul.f32 %v292_v2, %v78_v53  ;;  %v82_v61 = vsub.f32 %v49_v47, %v290_v1  ;;  %v83_v62 = vsub.f32 %v50_v48, %v290_v1 }
  0x31   :  { %v84_v63 = vsub.f32 %v51_v49, %v290_v1  ;;  %142 = vst [vmem:[#allocation7 + $0x70] sm:$0xff] %v110_v55  ;;  %v112_v5 = vmul.f32 %v292_v2, %v79_v56  ;;  %v113_v6 = vmul.f32 %v292_v2, %v80_v57  ;;  %v114_v7 = vmul.f32 %v292_v2, %v81_v58 }
  0x32   :  { %v85_v8 = vsub.f32 %v52_v54, %v290_v1  ;;  %143 = vst [vmem:[#allocation7 + $0x78] sm:$0xff] %v111_v60  ;;  %v115_v12 = vmul.f32 %v292_v2, %v82_v61  ;;  %v116_v13 = vmul.f32 %v292_v2, %v83_v62  ;;  %v86_v15 = vsub.f32 %v53_v59, %v290_v1 }
  0x33   :  { %v117_v14 = vmul.f32 %v292_v2, %v84_v63  ;;  %144 = vst [vmem:[#allocation7 + $0x80] sm:$0xff] %v112_v5  ;;  %145 = vst [vmem:[#allocation7 + $0x88] sm:$0xff] %v113_v6  ;;  %v87_v18 = vsub.f32 %v54_v0, %v290_v1  ;;  %v88_v19 = vsub.f32 %v55_v3, %v290_v1 }
  0x34   :  { %146 = vst [vmem:[#allocation7 + $0x90] sm:$0xff] %v114_v7  ;;  %v118_v17 = vmul.f32 %v292_v2, %v85_v8  ;;  %v89_v20 = vsub.f32 %v56_v4, %v290_v1  ;;  %147 = vst [vmem:[#allocation7 + $0x98] sm:$0xff] %v115_v12  ;;  %v119_v22 = vmul.f32 %v292_v2, %v86_v15 }
  0x35   :  { %148 = vst [vmem:[#allocation7 + $0xa0] sm:$0xff] %v116_v13  ;;  %149 = vst [vmem:[#allocation7 + $0xa8] sm:$0xff] %v117_v14  ;;  %v90_v23 = vsub.f32 %v57_v9, %v290_v1  ;;  %v91_v24 = vsub.f32 %v58_v10, %v290_v1  ;;  %v92_v25 = vsub.f32 %v59_v11, %v290_v1 }
  0x36   :  { %150 = vst [vmem:[#allocation7 + $0xb0] sm:$0xff] %v118_v17  ;;  %v120_v26 = vmul.f32 %v292_v2, %v87_v18  ;;  %v121_v27 = vmul.f32 %v292_v2, %v88_v19  ;;  %v122_v28 = vmul.f32 %v292_v2, %v89_v20  ;;  %v93_v29 = vsub.f32 %v60_v16, %v290_v1 }
  0x37   :  { %151 = vst [vmem:[#allocation7 + $0xb8] sm:$0xff] %v119_v22  ;;  %v123_v30 = vmul.f32 %v292_v2, %v90_v23  ;;  %v124_v31 = vmul.f32 %v292_v2, %v91_v24  ;;  %v125_v32 = vmul.f32 %v292_v2, %v92_v25  ;;  %v94_v33 = vsub.f32 %v61_v21, %v290_v1 }
  0x38   :  { %152 = vst [vmem:[#allocation7 + $0xc0] sm:$0xff] %v120_v26  ;;  %153 = vst [vmem:[#allocation7 + $0xc8] sm:$0xff] %v121_v27  ;;  %v126_v34 = vmul.f32 %v292_v2, %v93_v29 }
  0x39   :  { %154 = vst [vmem:[#allocation7 + $0xd0] sm:$0xff] %v122_v28  ;;  %155 = vst [vmem:[#allocation7 + $0xd8] sm:$0xff] %v123_v30  ;;  %v127_v35 = vmul.f32 %v292_v2, %v94_v33 }
  0x3a   :  { %156 = vst [vmem:[#allocation7 + $0xe0] sm:$0xff] %v124_v31  ;;  %157 = vst [vmem:[#allocation7 + $0xe8] sm:$0xff] %v125_v32 }
  0x3b   :  { %158 = vst [vmem:[#allocation7 + $0xf0] sm:$0xff] %v126_v34  ;;  %159 = vst [vmem:[#allocation7 + $0xf8] sm:$0xff] %v127_v35 }
  0x3c   :  { %226 = shalt.err (!%p223_p1)
}
  0x3d   :  { %s227_s10 = scalar_lea.hbm %s375_s2, 4096 }
  0x3e   :  { %p228_p2 = scmp.ne.s32.totalorder %s375_s2, %s227_s10  ;;  %p231_p3 = scmp.lt.u32.totalorder %s227_s10, %s375_s2 }
  0x40   :  { %p233_p4 = pnand %p231_p3, %p228_p2 }
  0x42   :  { %236 = shalt.err (!%p233_p4)
}
  0x43   :  { %171 = dma.vmem_to_hbm [thread:$0]  %s166_s6, 4096, %s375_s2, [#allocation6], %s245_s28, %s245_s28, %s246_s29  }
  0x44   :  { %241 = dma.done.wait [#allocation6], 4096  }
  0x45   :  { %242 = vsyncadd [#allocation6], 4294963200 }
  0x46   :  { %175 = vsyncpa [#allocation5], 1 }
  0x47   :  { %176 = vsyncpa [#allocation6], 1 }

</bundles_post_ra>
